<compile_context>
chip_gen: v7x
topology: tpu7x:2x2x1
jax: 0.10.0
libtpu: 0.0.40
codegen_flags: <defaults>
</compile_context>

<pallas_src>
import jax
import jax.numpy as jnp
import numpy as np
from jax.experimental import pallas as pl
from jax.experimental.pallas import tpu as pltpu


def _round_up(x, m):
    return ((x + m - 1) // m) * m


# --------------------------------------------------------------------------
# Kernel: one grid step maps (tile_t, 1) token ids -> (tile_t, H_pad) rows of
# the fused table W2 via a single one-hot @ W2 MXU matmul.
# --------------------------------------------------------------------------
def qus_embedding_kernel(ids_ref, w2_ref, out_ref):
    ids = ids_ref[...]                                   # (tile_t, 1) int32
    t = ids.shape[0]
    v = w2_ref.shape[0]

    # Compare in int32 (cheap on every VPU generation, incl. v5e with no bf16
    # VALU); cast the exact 0/1 one-hot to the matmul dtype only at the end.
    lane_iota = jax.lax.broadcasted_iota(jnp.int32, (t, v), 1)
    onehot = (lane_iota == ids).astype(w2_ref.dtype)     # (tile_t, V_pad)

    out = jnp.dot(onehot, w2_ref[...], preferred_element_type=jnp.float32)
    out_ref[...] = out.astype(out_ref.dtype)             # lane-dense, unmasked vst


# --------------------------------------------------------------------------
# Weight-load-time fusion (hoisted off the per-call hot path).
# --------------------------------------------------------------------------
def fuse_qus_embedding_params(emb_table, linear_weight, linear_bias,
                              *, compute_dtype=jnp.bfloat16):
    """Precompute W2[v] = emb_table[v] @ W.T + b, zero-padded to (V_pad, H_pad).

    Call ONCE when weights are loaded and pass the result to qus_embedding_map
    via `fused_table=` -- this is a full (V,E)@(E,H) matmul + HBM
    materialization that must not run on every forward call.
    """
    V, E = emb_table.shape
    H = linear_weight.shape[0]
    w2 = (emb_table.astype(jnp.float32) @ linear_weight.T.astype(jnp.float32)
          + linear_bias.astype(jnp.float32))             # (V, H) f32

    # +1 guarantees at least one all-zero row (used for padded token slots)
    # even when V is already a multiple of 128.
    V_pad = _round_up(max(V + 1, 128), 128)
    H_pad = _round_up(max(H, 128), 128)
    w2_pad = jnp.zeros((V_pad, H_pad), compute_dtype).at[:V, :H].set(
        w2.astype(compute_dtype))
    return w2_pad


# --------------------------------------------------------------------------
# Forward wrapper.
# --------------------------------------------------------------------------
def qus_embedding_map(qus, emb_table, linear_weight, linear_bias, *,
                      fused_table=None, compute_dtype=jnp.bfloat16,
                      tile_t=2048, out_dtype=jnp.float32,
                      return_padded=False):
    """Pallas equivalent of QusEmbeddingMap.forward.

    qus:           (B, S) int token ids
    emb_table:     (V, E) float32  (V = word_size + 1, padding row zeroed)
    linear_weight: (H, E) float32  (torch nn.Linear layout)
    linear_bias:   (H,)   float32
    fused_table:   optional precomputed fuse_qus_embedding_params(...) result
    returns:       (B, S, H) out_dtype   (or the padded (T_pad, H_pad) buffer
                   plus (T, H) when return_padded=True, to skip the slice copy)
    """
    B, S = qus.shape
    V, E = emb_table.shape
    H = linear_weight.shape[0]
    T = B * S

    if fused_table is None:
        # TODO(synk): precompute at weight-load time in production; rebuilding
        # W2 here costs a (V,E)@(E,H) XLA matmul per forward call.
        fused_table = fuse_qus_embedding_params(
            emb_table, linear_weight, linear_bias, compute_dtype=compute_dtype)
    w2_pad = fused_table
    V_pad, H_pad = w2_pad.shape

    # ---- token ids: clamp (match jnp.take), flatten, pad to the tile grid ----
    ids_flat = jnp.clip(qus.reshape(T).astype(jnp.int32), 0, V - 1)

    # Sub-32-bit matmul operands pack 2 rows per sublane -> align tiles to 32.
    sub_align = 32 if jnp.dtype(w2_pad.dtype).itemsize < 4 else 8
    tile_t = max(sub_align,
                 _round_up(min(tile_t, _round_up(T, sub_align)), sub_align))
    # v7x megacore: make sure the "parallel" axis has >= 2 tiles when T allows.
    if _round_up(T, sub_align) // tile_t < 2 and _round_up(T, sub_align) >= 2 * sub_align:
        tile_t = _round_up(pl.cdiv(T, 2), sub_align)
    T_pad = _round_up(T, tile_t)

    # Padded rows get id == V, a guaranteed all-zero row of w2_pad -> exact 0.
    ids = jnp.full((T_pad, 1), V, jnp.int32).at[:T, 0].set(ids_flat)

    grid = (T_pad // tile_t,)
    itemsize_w2 = jnp.dtype(w2_pad.dtype).itemsize
    itemsize_out = jnp.dtype(out_dtype).itemsize
    cost = pl.CostEstimate(
        flops=2 * T_pad * V_pad * H_pad,
        transcendentals=0,
        bytes_accessed=(T_pad * 4                       # ids
                        + V_pad * H_pad * itemsize_w2   # fused table (once)
                        + T_pad * H_pad * itemsize_out))  # output writeback

    def _run(w2_spec):
        return pl.pallas_call(
            qus_embedding_kernel,
            out_shape=jax.ShapeDtypeStruct((T_pad, H_pad), out_dtype),
            grid=grid,
            in_specs=[
                pl.BlockSpec((tile_t, 1), lambda i: (i, 0)),   # per-tile ids
                w2_spec,                                       # resident fused table
            ],
            out_specs=pl.BlockSpec((tile_t, H_pad), lambda i: (i, 0)),
            compiler_params=pltpu.CompilerParams(
                dimension_semantics=("parallel",),             # v7x: shard tiles over 2 TCs
            ),
            cost_estimate=cost,
        )(ids, w2_pad)

    try:
        # Constant index_map -> never re-DMA'd; single-buffer it to halve its
        # VMEM footprint (matters once V*H grows, esp. v7x's 64 MiB VMEM).
        out = _run(pl.BlockSpec((V_pad, H_pad), lambda i: (0, 0),
                                pipeline_mode=pl.Buffered(1)))
    except Exception:
        # Fallback for jax versions without pipeline_mode plumbing on TPU.
        out = _run(pl.BlockSpec((V_pad, H_pad), lambda i: (0, 0)))

    if return_padded:
        # Skip the extra full HBM pass of slice+reshape; caller slices lazily.
        return out, (T, H)
    return out[:T, :H].reshape(B, S, H)


if __name__ == "__main__":
    # Small, module-consistent shapes.
    word_size = 64          # vocab size (WordEmbedding adds a padding row -> V = 65)
    embedding_dim = 32
    hidden_size = 32
    B, S = 2, 8

    key = jax.random.PRNGKey(0)
    k_emb, k_w, k_b, k_ids = jax.random.split(key, 4)

    # Deterministic "GloVe-like" embedding table; padding row (index word_size) zero.
    V = word_size + 1
    emb_table = jax.random.normal(k_emb, (V, embedding_dim), dtype=jnp.float32)
    emb_table = emb_table.at[word_size].set(0.0)

    # nn.Linear(embedding_dim, hidden_size) parameters (torch layout: weight (H, E)).
    linear_weight = (jax.random.normal(k_w, (hidden_size, embedding_dim),
                                       dtype=jnp.float32)
                     / np.sqrt(embedding_dim))
    linear_bias = jax.random.normal(k_b, (hidden_size,), dtype=jnp.float32) * 0.01

    # Token ids, including some padding tokens (index word_size).
    qus = jax.random.randint(k_ids, (B, S), 0, V, dtype=jnp.int32)

    # Pure-JAX reference: embedding lookup + linear.
    ref = jnp.take(emb_table, qus, axis=0) @ linear_weight.T + linear_bias

    # --- production path: bf16 compute, fused table precomputed once ---------
    w2_bf16 = fuse_qus_embedding_params(emb_table, linear_weight, linear_bias,
                                        compute_dtype=jnp.bfloat16)
    out_bf16 = qus_embedding_map(qus, emb_table, linear_weight, linear_bias,
                                 fused_table=w2_bf16)
    out_bf16 = jax.block_until_ready(out_bf16)
    np.testing.assert_allclose(np.asarray(out_bf16), np.asarray(ref),
                               rtol=2e-2, atol=2e-2)

    # --- bit-tight path: f32 compute (table fused on the fly) ----------------
    out_f32 = qus_embedding_map(qus, emb_table, linear_weight, linear_bias,
                                compute_dtype=jnp.float32)
    out_f32 = jax.block_until_ready(out_f32)
    np.testing.assert_allclose(np.asarray(out_f32), np.asarray(ref),
                               rtol=1e-5, atol=1e-5)

    print("KERNEL_OK")
</pallas_src>

<mosaic_0001>
module attributes {stable_mosaic.version = 11 : i64} {
  func.func @qus_embedding_kernel(%arg0: i32, %arg1: memref<32x1xi32, #tpu.memory_space<vmem>>, %arg2: memref<128x128xbf16, #tpu.memory_space<vmem>>, %arg3: memref<32x128xf32, #tpu.memory_space<vmem>>) attributes {dimension_semantics = [#tpu.dimension_semantics<parallel>], iteration_bounds = array<i64: 1>, scalar_prefetch = 0 : i64, scratch_operands = 0 : i64, tpu.core_type = #tpu.core_type<tc>, window_params = [{transform_indices = @transform_0, window_bounds = array<i64: 32, 1>}, {pipeline_mode = #tpu.pipeline_mode<synchronous>, transform_indices = @transform_1, window_bounds = array<i64: 128, 128>}, {transform_indices = @transform_2, window_bounds = array<i64: 32, 128>}]} {
    %c0 = arith.constant 0 : index
    %c0_0 = arith.constant 0 : index
    %0 = vector.load %arg1[%c0, %c0_0] : memref<32x1xi32, #tpu.memory_space<vmem>>, vector<32x1xi32>
    %1 = tpu.iota {dimensions = array<i32: 1>} : vector<32x128xi32>
    %2 = vector.broadcast %0 : vector<32x1xi32> to vector<32x128xi32>
    %3 = arith.cmpi eq, %1, %2 : vector<32x128xi32>
    %4 = arith.extui %3 : vector<32x128xi1> to vector<32x128xi32>
    %5 = arith.sitofp %4 : vector<32x128xi32> to vector<32x128xf32>
    %6 = arith.truncf %5 : vector<32x128xf32> to vector<32x128xbf16>
    %c0_1 = arith.constant 0 : index
    %c0_2 = arith.constant 0 : index
    %7 = vector.load %arg2[%c0_1, %c0_2] : memref<128x128xbf16, #tpu.memory_space<vmem>>, vector<128x128xbf16>
    %cst = arith.constant dense<0.000000e+00> : vector<32x128xf32>
    %8 = tpu.matmul %6, %7, %cst {dimension_numbers = #tpu.dot_dimension_numbers<[1], [0], [0], [1], [0, 0, 1, 1], [], []>} : vector<32x128xbf16>, vector<128x128xbf16>, vector<32x128xf32> -> vector<32x128xf32>
    %c0_3 = arith.constant 0 : index
    %c0_4 = arith.constant 0 : index
    %9 = vector.load %arg3[%c0_3, %c0_4] : memref<32x128xf32, #tpu.memory_space<vmem>>, vector<32x128xf32>
    tpu.vector_store %arg3[%c0_3, %c0_4], %8 {strides = array<i32>} : memref<32x128xf32, #tpu.memory_space<vmem>>, vector<32x128xf32>,
    return
  }
  func.func @transform_0(%arg0: i32) -> (i32, i32) {
    %c0_i32 = arith.constant 0 : i32
    %c0_i32_0 = arith.constant 0 : i32
    return %arg0, %c0_i32 : i32, i32
  }
  func.func @transform_1(%arg0: i32) -> (i32, i32) {
    %c0_i32 = arith.constant 0 : i32
    %c0_i32_0 = arith.constant 0 : i32
    %c0_i32_1 = arith.constant 0 : i32
    return %c0_i32, %c0_i32_0 : i32, i32
  }
  func.func @transform_2(%arg0: i32) -> (i32, i32) {
    %c0_i32 = arith.constant 0 : i32
    %c0_i32_0 = arith.constant 0 : i32
    return %arg0, %c0_i32 : i32, i32
  }
}

module attributes {stable_mosaic.version = 11 : i64} {
  func.func @qus_embedding_kernel(%arg0: i32, %arg1: memref<32x1xi32, #tpu.memory_space<vmem>>, %arg2: memref<128x128xbf16, #tpu.memory_space<vmem>>, %arg3: memref<32x128xf32, #tpu.memory_space<vmem>>) attributes {dimension_semantics = [#tpu.dimension_semantics<parallel>], iteration_bounds = array<i64: 1>, scalar_prefetch = 0 : i64, scratch_operands = 0 : i64, tpu.core_type = #tpu.core_type<tc>, window_params = [{transform_indices = @transform_0, window_bounds = array<i64: 32, 1>}, {pipeline_mode = #tpu.pipeline_mode<synchronous>, transform_indices = @transform_1, window_bounds = array<i64: 128, 128>}, {transform_indices = @transform_2, window_bounds = array<i64: 32, 128>}]} {
    %c0 = arith.constant 0 : index
    %c0_0 = arith.constant 0 : index
    %0 = vector.load %arg1[%c0, %c0_0] : memref<32x1xi32, #tpu.memory_space<vmem>>, vector<32x1xi32>
    %1 = tpu.iota {dimensions = array<i32: 1>} : vector<32x128xi32>
    %2 = vector.broadcast %0 : vector<32x1xi32> to vector<32x128xi32>
    %3 = arith.cmpi eq, %1, %2 : vector<32x128xi32>
    %4 = arith.extui %3 : vector<32x128xi1> to vector<32x128xi32>
    %5 = arith.sitofp %4 : vector<32x128xi32> to vector<32x128xf32>
    %6 = arith.truncf %5 : vector<32x128xf32> to vector<32x128xbf16>
    %c0_1 = arith.constant 0 : index
    %c0_2 = arith.constant 0 : index
    %7 = vector.load %arg2[%c0_1, %c0_2] : memref<128x128xbf16, #tpu.memory_space<vmem>>, vector<128x128xbf16>
    %cst = arith.constant dense<0.000000e+00> : vector<32x128xf32>
    %8 = tpu.matmul %6, %7, %cst {dimension_numbers = #tpu.dot_dimension_numbers<[1], [0], [0], [1], [0, 0, 1, 1], [], []>} : vector<32x128xbf16>, vector<128x128xbf16>, vector<32x128xf32> -> vector<32x128xf32>
    %c0_3 = arith.constant 0 : index
    %c0_4 = arith.constant 0 : index
    %9 = vector.load %arg3[%c0_3, %c0_4] : memref<32x128xf32, #tpu.memory_space<vmem>>, vector<32x128xf32>
    tpu.vector_store %arg3[%c0_3, %c0_4], %8 {strides = array<i32>} : memref<32x128xf32, #tpu.memory_space<vmem>>, vector<32x128xf32>,
    return
  }
  func.func @transform_0(%arg0: i32) -> (i32, i32) {
    %c0_i32 = arith.constant 0 : i32
    %c0_i32_0 = arith.constant 0 : i32
    return %arg0, %c0_i32 : i32, i32
  }
  func.func @transform_1(%arg0: i32) -> (i32, i32) {
    %c0_i32 = arith.constant 0 : i32
    %c0_i32_0 = arith.constant 0 : i32
    %c0_i32_1 = arith.constant 0 : i32
    return %c0_i32, %c0_i32_0 : i32, i32
  }
  func.func @transform_2(%arg0: i32) -> (i32, i32) {
    %c0_i32 = arith.constant 0 : i32
    %c0_i32_0 = arith.constant 0 : i32
    return %arg0, %c0_i32 : i32, i32
  }
}

</mosaic_0001>

<bundles_post_ra>
// kernel: tpu_custom_call.1
= control target key start
LH: loop header
LB: loop body
LE: loop exit
PB: predicated region body
PF: predicated region fallthrough
CT: control target
= control target key end

     0   :  { %7 = vsyncpa [#allocation3], 0  ;;  %s364_s0 = inlined_call_operand.vmem [shape: s32[32,1], index: 0, kind: input, shape index: {}]   ;;  %s365_s1 = inlined_call_operand.hbm [shape: bf16[128,128], index: 1, kind: input, shape index: {}]   ;;  %s366_s2 = inlined_call_operand.hbm [shape: f32[32,128], index: 2, kind: output, shape index: {}]  }
   0x1   :  { %8 = vsyncpa [#allocation4], 0  ;;  %s305_s9 = smov [#allocation2]   ;;  %s257_s13 = scalar_lea.hbm %s365_s1, 1024 }
   0x2   :  { %s16_s10 = sshll.u32 %s305_s9, 4  ;;  %p258_p0 = scmp.ne.s32.totalorder %s365_s1, %s257_s13  ;;  %s17_s10 = int_to_ptr.vmem [resolvable:$true] %s16_s10 }
   0x3   :  { %p261_p1 = scmp.lt.u32.totalorder %s257_s13, %s365_s1 }
   0x5   :  { %p263_p2 = pnand %p261_p1, %p258_p0 }
   0x7   :  { %266 = shalt.err (!%p263_p2)
}
   0x8   :  { %s267_s18 = scalar_lea.vmem %s17_s10, 1024  ;;  %p272_p4 = scmp.lt.s32.totalorder %s17_s10, %s17_s10 }
   0x9   :  { %p268_p3 = scmp.ne.s32.totalorder %s17_s10, %s267_s18  ;;  %p273_p5 = scmp.lt.s32.totalorder %s267_s18, %s267_s18 }
   0xb   :  { %p274_p6 = por %p273_p5, %p272_p4 }
   0xd   :  { %p275_p7 = pnand %p274_p6, %p268_p3 }
   0xf   :  { %278 = shalt.err (!%p275_p7)
}
  0x10   :  { %s306_s19 = smov 64   ;;  %s307_s20 = smov 4  }
  0x11   :  { %22 = dma.hbm_to_vmem [thread:$0]  %s365_s1, 1024, %s17_s10, [#allocation3], %s306_s19, %s306_s19, %s307_s20  }
  0x12   :  { %301 = dma.done.wait [#allocation3], 1024  }
  0x13   :  { %302 = vsyncadd [#allocation3], 4294966272  ;;  %v308_v0 = vmov 0   ;;  %v29_v1 = vld [vmem:[%s364_s0 + $0x10] sm:$0xff]  ;;  %v27_v2 = vld [vmem:[%s364_s0] sm:$0xff]  ;;  %v31_v13 = vlaneseq }
  0x14   :  { %248 = vset.pattern.permute.xlu1 %v308_v0  ;;  %247 = vset.pattern.permute.xlu0 %v308_v0  ;;  %v30_v3 = vld [vmem:[%s364_s0 + $0x18] sm:$0xff]  ;;  %v28_v4 = vld [vmem:[%s364_s0 + $0x8] sm:$0xff]  ;;  %v249_v5 = vld [vmem:[#allocation2] sm:$0xff]   ;;  %v309_v19 = vmov 1.0|1.0   ;;  %s310_s0 = smov [#allocation5]  }
  0x15   :  { %40 = vperm.xlu1 %248, %v29_v1   ;;  %34 = vperm.xlu0 %247, %v27_v2   ;;  %v250_v6 = vld [vmem:[#allocation2 + $0x8] sm:$0xff]   ;;  %v251_v7 = vld [vmem:[#allocation2 + $0x10] sm:$0xff]   ;;  %v252_v8 = vld [vmem:[#allocation2 + $0x18] sm:$0xff]   ;;  %v32_v16 = vand.u32 127, %v31_v13  ;;  %s181_s30 = sshll.u32 %s310_s0, 4  ;;  %s182_s30 = int_to_ptr.vmem [resolvable:$true] %s181_s30 }
  0x16   :  { %219 = vmatprep.subr.bf16.mxu0 %v249_v5  ;;  %v253_v9 = vld [vmem:[#allocation2 + $0x20] sm:$0xff]   ;;  %v254_v10 = vld [vmem:[#allocation2 + $0x28] sm:$0xff]   ;;  %v255_v11 = vld [vmem:[#allocation2 + $0x30] sm:$0xff]   ;;  %s279_s3 = scalar_lea.vmem %s182_s30, 512  ;;  %p284_p9 = scmp.lt.s32.totalorder %s182_s30, %s182_s30 }
  0x17   :  { %220 = vmatpush3.bf16.msra.mxu0 %v249_v5  ;;  %v256_v12 = vld [vmem:[#allocation2 + $0x38] sm:$0xff]   ;;  %p280_p8 = scmp.ne.s32.totalorder %s182_s30, %s279_s3  ;;  %p285_p10 = scmp.lt.s32.totalorder %s279_s3, %s279_s3 }
  0x18   :  { %221 = vmatprep.subr.bf16.mxu0 %v250_v6 }
  0x19   :  { %43 = vperm.xlu1 %248, %v30_v3   ;;  %37 = vperm.xlu0 %247, %v28_v4   ;;  %p286_p11 = por %p285_p10, %p284_p9 }
  0x1b   :  { %222 = vmatpush3.bf16.msra.mxu0 %v250_v6  ;;  %p287_p12 = pnand %p286_p11, %p280_p8 }
  0x1c   :  { %223 = vmatprep.subr.bf16.mxu0 %v251_v7 }
  0x1f   :  { %224 = vmatpush3.bf16.msra.mxu0 %v251_v7 }
  0x20   :  { %225 = vmatprep.subr.bf16.mxu0 %v252_v8 }
  0x23   :  { %226 = vmatpush3.bf16.msra.mxu0 %v252_v8 }
  0x24   :  { %227 = vmatprep.subr.bf16.mxu0 %v253_v9 }
  0x27   :  { %228 = vmatpush3.bf16.msra.mxu0 %v253_v9 }
  0x28   :  { %229 = vmatprep.subr.bf16.mxu0 %v254_v10 }
  0x2b   :  { %230 = vmatpush3.bf16.msra.mxu0 %v254_v10 }
  0x2c   :  { %231 = vmatprep.subr.bf16.mxu0 %v255_v11 }
  0x2f   :  { %232 = vmatpush3.bf16.msra.mxu0 %v255_v11 }
  0x30   :  { %233 = vmatprep.subr.bf16.mxu0 %v256_v12 }
  0x33   :  { %234 = vmatpush3.bf16.msra.mxu0 %v256_v12 }
  0x94   :  { %v41_v14 = vpop.permute.xlu1 %40  ;;  %v35_v15 = vpop.permute.xlu0 %34 }
  0x95   :  { %vm47_vm0 = vcmp.eq.s32.totalorder %v32_v16, %v41_v14  ;;  %vm45_vm3 = vcmp.eq.s32.totalorder %v32_v16, %v35_v15 }
  0x98   :  { %v44_v17 = vpop.permute.xlu1 %43  ;;  %v38_v18 = vpop.permute.xlu0 %37 }
  0x99   :  { %vm48_vm1 = vcmp.eq.s32.totalorder %v32_v16, %v44_v17  ;;  %vm46_vm2 = vcmp.eq.s32.totalorder %v32_v16, %v38_v18 }
  0x9a   :  { %vm207_vm4 = vmpackc.low %vm48_vm1, %vm47_vm0 }
  0x9b   :  { %vm205_vm5 = vmpackc.low %vm46_vm2, %vm45_vm3 }
  0x9c   :  { %235 = vmatprep.mubr.msk.bf16.mxu0 %vm205_vm5, %v309_v19 }
  0x9d   :  { %236 = vmatmul.mubr.msk.bf16.vlgmr.msra.gmra.mrb[0].mxu0 %vm207_vm4, %v309_v19 }
 0x170   :  { %v237_v20 = vpop.f32.mrb[0].mxu0 }
 0x171   :  { %174 = vst [vmem:[#allocation5 + $0x10] sm:$0xff] %v237_v20  ;;  %v157_v21 = vpop.f32.mrb[1].mxu0 }
 0x172   :  { %172 = vst [vmem:[#allocation5] sm:$0xff] %v157_v21  ;;  %v238_v22 = vpop.f32.mrb[2].mxu0 }
 0x173   :  { %175 = vst [vmem:[#allocation5 + $0x18] sm:$0xff] %v238_v22  ;;  %v160_v23 = vpop.f32.mrb[3].mxu0 }
 0x174   :  { %173 = vst [vmem:[#allocation5 + $0x8] sm:$0xff] %v160_v23 }
 0x175   :  { %290 = shalt.err (!%p287_p12)
}
 0x176   :  { %s291_s6 = scalar_lea.hbm %s366_s2, 512 }
 0x177   :  { %p292_p13 = scmp.ne.s32.totalorder %s366_s2, %s291_s6  ;;  %p295_p0 = scmp.lt.u32.totalorder %s291_s6, %s366_s2 }
 0x179   :  { %p297_p1 = pnand %p295_p0, %p292_p13 }
 0x17b   :  { %300 = shalt.err (!%p297_p1)
}
 0x17c   :  { %s311_s11 = smov 128   ;;  %s312_s12 = smov 8  }
 0x17d   :  { %187 = dma.vmem_to_hbm [thread:$0]  %s182_s30, 512, %s366_s2, [#allocation4], %s311_s11, %s311_s11, %s312_s12  }
 0x17e   :  { %303 = dma.done.wait [#allocation4], 512  }
 0x17f   :  { %304 = vsyncadd [#allocation4], 4294966784 }
 0x180   :  { %191 = vsyncpa [#allocation3], 1 }
 0x181   :  { %192 = vsyncpa [#allocation4], 1 }

// kernel: tpu_custom_call.1
= control target key start
LH: loop header
LB: loop body
LE: loop exit
PB: predicated region body
PF: predicated region fallthrough
CT: control target
= control target key end

     0   :  { %7 = vsyncpa [#allocation3], 0  ;;  %s364_s0 = inlined_call_operand.vmem [shape: s32[32,1], index: 0, kind: input, shape index: {}]   ;;  %s365_s1 = inlined_call_operand.hbm [shape: bf16[128,128], index: 1, kind: input, shape index: {}]   ;;  %s366_s2 = inlined_call_operand.hbm [shape: f32[32,128], index: 2, kind: output, shape index: {}]  }
   0x1   :  { %8 = vsyncpa [#allocation4], 0  ;;  %s305_s9 = smov [#allocation2]   ;;  %s257_s13 = scalar_lea.hbm %s365_s1, 1024 }
   0x2   :  { %s16_s10 = sshll.u32 %s305_s9, 4  ;;  %p258_p0 = scmp.ne.s32.totalorder %s365_s1, %s257_s13  ;;  %s17_s10 = int_to_ptr.vmem [resolvable:$true] %s16_s10 }
   0x3   :  { %p261_p1 = scmp.lt.u32.totalorder %s257_s13, %s365_s1 }
   0x5   :  { %p263_p2 = pnand %p261_p1, %p258_p0 }
   0x7   :  { %266 = shalt.err (!%p263_p2)
}
   0x8   :  { %s267_s18 = scalar_lea.vmem %s17_s10, 1024  ;;  %p272_p4 = scmp.lt.s32.totalorder %s17_s10, %s17_s10 }
   0x9   :  { %p268_p3 = scmp.ne.s32.totalorder %s17_s10, %s267_s18  ;;  %p273_p5 = scmp.lt.s32.totalorder %s267_s18, %s267_s18 }
   0xb   :  { %p274_p6 = por %p273_p5, %p272_p4 }
   0xd   :  { %p275_p7 = pnand %p274_p6, %p268_p3 }
   0xf   :  { %278 = shalt.err (!%p275_p7)
}
  0x10   :  { %s306_s19 = smov 64   ;;  %s307_s20 = smov 4  }
  0x11   :  { %22 = dma.hbm_to_vmem [thread:$0]  %s365_s1, 1024, %s17_s10, [#allocation3], %s306_s19, %s306_s19, %s307_s20  }
  0x12   :  { %301 = dma.done.wait [#allocation3], 1024  }
  0x13   :  { %302 = vsyncadd [#allocation3], 4294966272  ;;  %v308_v0 = vmov 0   ;;  %v29_v1 = vld [vmem:[%s364_s0 + $0x10] sm:$0xff]  ;;  %v27_v2 = vld [vmem:[%s364_s0] sm:$0xff]  ;;  %v31_v13 = vlaneseq }
  0x14   :  { %248 = vset.pattern.permute.xlu1 %v308_v0  ;;  %247 = vset.pattern.permute.xlu0 %v308_v0  ;;  %v30_v3 = vld [vmem:[%s364_s0 + $0x18] sm:$0xff]  ;;  %v28_v4 = vld [vmem:[%s364_s0 + $0x8] sm:$0xff]  ;;  %v249_v5 = vld [vmem:[#allocation2] sm:$0xff]   ;;  %v309_v19 = vmov 1.0|1.0   ;;  %s310_s0 = smov [#allocation5]  }
  0x15   :  { %40 = vperm.xlu1 %248, %v29_v1   ;;  %34 = vperm.xlu0 %247, %v27_v2   ;;  %v250_v6 = vld [vmem:[#allocation2 + $0x8] sm:$0xff]   ;;  %v251_v7 = vld [vmem:[#allocation2 + $0x10] sm:$0xff]   ;;  %v252_v8 = vld [vmem:[#allocation2 + $0x18] sm:$0xff]   ;;  %v32_v16 = vand.u32 127, %v31_v13  ;;  %s181_s30 = sshll.u32 %s310_s0, 4  ;;  %s182_s30 = int_to_ptr.vmem [resolvable:$true] %s181_s30 }
  0x16   :  { %219 = vmatprep.subr.bf16.mxu0 %v249_v5  ;;  %v253_v9 = vld [vmem:[#allocation2 + $0x20] sm:$0xff]   ;;  %v254_v10 = vld [vmem:[#allocation2 + $0x28] sm:$0xff]   ;;  %v255_v11 = vld [vmem:[#allocation2 + $0x30] sm:$0xff]   ;;  %s279_s3 = scalar_lea.vmem %s182_s30, 512  ;;  %p284_p9 = scmp.lt.s32.totalorder %s182_s30, %s182_s30 }
  0x17   :  { %220 = vmatpush3.bf16.msra.mxu0 %v249_v5  ;;  %v256_v12 = vld [vmem:[#allocation2 + $0x38] sm:$0xff]   ;;  %p280_p8 = scmp.ne.s32.totalorder %s182_s30, %s279_s3  ;;  %p285_p10 = scmp.lt.s32.totalorder %s279_s3, %s279_s3 }
  0x18   :  { %221 = vmatprep.subr.bf16.mxu0 %v250_v6 }
  0x19   :  { %43 = vperm.xlu1 %248, %v30_v3   ;;  %37 = vperm.xlu0 %247, %v28_v4   ;;  %p286_p11 = por %p285_p10, %p284_p9 }
  0x1b   :  { %222 = vmatpush3.bf16.msra.mxu0 %v250_v6  ;;  %p287_p12 = pnand %p286_p11, %p280_p8 }
  0x1c   :  { %223 = vmatprep.subr.bf16.mxu0 %v251_v7 }
  0x1f   :  { %224 = vmatpush3.bf16.msra.mxu0 %v251_v7 }
  0x20   :  { %225 = vmatprep.subr.bf16.mxu0 %v252_v8 }
  0x23   :  { %226 = vmatpush3.bf16.msra.mxu0 %v252_v8 }
  0x24   :  { %227 = vmatprep.subr.bf16.mxu0 %v253_v9 }
  0x27   :  { %228 = vmatpush3.bf16.msra.mxu0 %v253_v9 }
  0x28   :  { %229 = vmatprep.subr.bf16.mxu0 %v254_v10 }
  0x2b   :  { %230 = vmatpush3.bf16.msra.mxu0 %v254_v10 }
  0x2c   :  { %231 = vmatprep.subr.bf16.mxu0 %v255_v11 }
  0x2f   :  { %232 = vmatpush3.bf16.msra.mxu0 %v255_v11 }
  0x30   :  { %233 = vmatprep.subr.bf16.mxu0 %v256_v12 }
  0x33   :  { %234 = vmatpush3.bf16.msra.mxu0 %v256_v12 }
  0x94   :  { %v41_v14 = vpop.permute.xlu1 %40  ;;  %v35_v15 = vpop.permute.xlu0 %34 }
  0x95   :  { %vm47_vm0 = vcmp.eq.s32.totalorder %v32_v16, %v41_v14  ;;  %vm45_vm3 = vcmp.eq.s32.totalorder %v32_v16, %v35_v15 }
  0x98   :  { %v44_v17 = vpop.permute.xlu1 %43  ;;  %v38_v18 = vpop.permute.xlu0 %37 }
  0x99   :  { %vm48_vm1 = vcmp.eq.s32.totalorder %v32_v16, %v44_v17  ;;  %vm46_vm2 = vcmp.eq.s32.totalorder %v32_v16, %v38_v18 }
  0x9a   :  { %vm207_vm4 = vmpackc.low %vm48_vm1, %vm47_vm0 }
  0x9b   :  { %vm205_vm5 = vmpackc.low %vm46_vm2, %vm45_vm3 }
  0x9c   :  { %235 = vmatprep.mubr.msk.bf16.mxu0 %vm205_vm5, %v309_v19 }
  0x9d   :  { %236 = vmatmul.mubr.msk.bf16.vlgmr.msra.gmra.mrb[0].mxu0 %vm207_vm4, %v309_v19 }
 0x170   :  { %v237_v20 = vpop.f32.mrb[0].mxu0 }
 0x171   :  { %174 = vst [vmem:[#allocation5 + $0x10] sm:$0xff] %v237_v20  ;;  %v157_v21 = vpop.f32.mrb[1].mxu0 }
 0x172   :  { %172 = vst [vmem:[#allocation5] sm:$0xff] %v157_v21  ;;  %v238_v22 = vpop.f32.mrb[2].mxu0 }
 0x173   :  { %175 = vst [vmem:[#allocation5 + $0x18] sm:$0xff] %v238_v22  ;;  %v160_v23 = vpop.f32.mrb[3].mxu0 }
 0x174   :  { %173 = vst [vmem:[#allocation5 + $0x8] sm:$0xff] %v160_v23 }
 0x175   :  { %290 = shalt.err (!%p287_p12)
}
 0x176   :  { %s291_s6 = scalar_lea.hbm %s366_s2, 512 }
 0x177   :  { %p292_p13 = scmp.ne.s32.totalorder %s366_s2, %s291_s6  ;;  %p295_p0 = scmp.lt.u32.totalorder %s291_s6, %s366_s2 }
 0x179   :  { %p297_p1 = pnand %p295_p0, %p292_p13 }
 0x17b   :  { %300 = shalt.err (!%p297_p1)
}
 0x17c   :  { %s311_s11 = smov 128   ;;  %s312_s12 = smov 8  }
 0x17d   :  { %187 = dma.vmem_to_hbm [thread:$0]  %s182_s30, 512, %s366_s2, [#allocation4], %s311_s11, %s311_s11, %s312_s12  }
 0x17e   :  { %303 = dma.done.wait [#allocation4], 512  }
 0x17f   :  { %304 = vsyncadd [#allocation4], 4294966784 }
 0x180   :  { %191 = vsyncpa [#allocation3], 1 }
 0x181   :  { %192 = vsyncpa [#allocation4], 1 }

</bundles_post_ra>
